<compile_context>
chip_gen: v7x
topology: tpu7x:2x2x1
jax: 0.10.0
libtpu: 0.0.40
codegen_flags: <defaults>
</compile_context>

<pallas_src>
import jax
import jax.numpy as jnp
from jax.experimental import pallas as pl
from jax.experimental.pallas import tpu as pltpu

_LANE = 128
_TARGET_BLOCK_BYTES = 4 * 1024 * 1024   # ~4 MiB per block (per perf review)
_MIN_SPLIT_SLAB_BYTES = 512 * 1024      # force grid >= 2 above this slab size
_MIN_PALLAS_BYTES = 256 * 1024          # below this, plain jnp.minimum wins
_VMEM_CAP_BYTES = 48 * 1024 * 1024      # keep headroom under v7x's 64 MiB VMEM


def _min_kernel(a_ref, b_ref, o_ref):
    # Elementwise min on the current VMEM tile (one VPU op per vreg).
    o_ref[...] = jnp.minimum(a_ref[...], b_ref[...])


def _sublane_multiple(dtype) -> int:
    # 32-bit dtypes tile at (8,128); sub-32-bit dtypes pack along sublanes.
    itemsize = jnp.dtype(dtype).itemsize
    return max(8, 32 // itemsize)


def and_module_forward(feat1, feat2, *, tile_rows=None,
                       min_pallas_bytes=_MIN_PALLAS_BYTES):
    """Pallas implementation of AndModule.forward: elementwise minimum."""
    assert feat1.shape == feat2.shape, "AndModule expects same-shaped inputs"

    # torch.min(a, b) promotes dtypes; mirror that.
    dtype = jnp.promote_types(feat1.dtype, feat2.dtype)
    feat1 = feat1.astype(dtype)
    feat2 = feat2.astype(dtype)

    orig_shape = feat1.shape
    itemsize = jnp.dtype(dtype).itemsize
    n = feat1.size
    bytes_per_array = n * itemsize

    # ---- fast paths: tiny inputs and ragged sizes --------------------------
    # Tiny: custom-call launch + being a fusion barrier costs more than the op.
    # Ragged (n % 128 != 0): avoiding pad/slice HBM copies matters more than
    # running in Pallas for a pure-bandwidth kernel.
    if bytes_per_array < min_pallas_bytes or (n % _LANE) != 0:
        return jnp.minimum(feat1, feat2)

    sub = _sublane_multiple(dtype)

    # ---- layout: flatten to a lane-dense (rows, 128) slab (free reshape) ---
    rows = n // _LANE
    a = feat1.reshape(rows, _LANE)
    b = feat2.reshape(rows, _LANE)
    slab_bytes = rows * _LANE * itemsize

    # ---- tile selection -----------------------------------------------------
    if rows <= sub or slab_bytes <= _MIN_SPLIT_SLAB_BYTES:
        # Small slab: a single full-extent block (always layout-legal).
        tr = rows
    else:
        max_tr = _TARGET_BLOCK_BYTES // (_LANE * itemsize)   # ~4 MiB / block
        tr = max_tr if tile_rows is None else min(tile_rows, max_tr)
        # Keep grid >= 2 so input-fetch / output-writeback overlap and the
        # ("parallel",) axis can be split across 2 TensorCores on v7x.
        tr = min(tr, (rows + 1) // 2)
        tr = max(sub, (tr // sub) * sub)

    grid = (pl.cdiv(rows, tr),)  # ragged last block is masked by Pallas

    block_bytes = tr * _LANE * itemsize
    # 3 arrays x 2 pipeline buffers; raise the scoped-VMEM limit so ~4 MiB
    # blocks are legal on v5e (16 MiB default) without exceeding v7x's 64 MiB.
    vmem_limit = int(min(_VMEM_CAP_BYTES,
                         max(3 * 2 * block_bytes + (2 << 20), 16 << 20)))

    cost = pl.CostEstimate(
        flops=n, transcendentals=0, bytes_accessed=3 * slab_bytes)

    out = pl.pallas_call(
        _min_kernel,
        out_shape=jax.ShapeDtypeStruct((rows, _LANE), dtype),
        grid_spec=pltpu.PrefetchScalarGridSpec(
            num_scalar_prefetch=0,
            grid=grid,
            in_specs=[
                pl.BlockSpec((tr, _LANE), lambda i: (i, 0)),
                pl.BlockSpec((tr, _LANE), lambda i: (i, 0)),
            ],
            out_specs=pl.BlockSpec((tr, _LANE), lambda i: (i, 0)),
        ),
        compiler_params=pltpu.CompilerParams(
            dimension_semantics=("parallel",),
            vmem_limit_bytes=vmem_limit),
        cost_estimate=cost,
    )(a, b)

    return out.reshape(orig_shape)


if __name__ == "__main__":
    key = jax.random.PRNGKey(0)
    k1, k2, k3, k4, k5, k6 = jax.random.split(key, 6)

    # Primary check: module-typical small NCHW feature maps (2,4,16,16).
    # Default path takes the jnp.minimum fast path; also force the Pallas
    # path once to make sure the kernel itself runs at this shape.
    feat1 = jax.random.normal(k1, (2, 4, 16, 16), dtype=jnp.float32)
    feat2 = jax.random.normal(k2, (2, 4, 16, 16), dtype=jnp.float32)
    ref = jnp.minimum(feat1, feat2)
    out_fast = jax.block_until_ready(and_module_forward(feat1, feat2))
    out_pallas = jax.block_until_ready(
        and_module_forward(feat1, feat2, min_pallas_bytes=0))
    assert out_pallas.shape == ref.shape and out_pallas.dtype == ref.dtype
    assert bool(jnp.all(out_fast == ref))
    assert bool(jnp.all(out_pallas == ref))

    # Medium check: 2 MiB/array slab -> multi-block grid (>=2) with big tiles.
    g1 = jax.random.normal(k3, (8, 4, 128, 128), dtype=jnp.float32)
    g2 = jax.random.normal(k4, (8, 4, 128, 128), dtype=jnp.float32)
    ref2 = jnp.minimum(g1, g2)
    out2 = jax.block_until_ready(and_module_forward(g1, g2))
    assert bool(jnp.all(out2 == ref2))
    # Same input forced to a finer grid (exercises multi-step pipelining).
    out3 = jax.block_until_ready(and_module_forward(g1, g2, tile_rows=512))
    assert bool(jnp.all(out3 == ref2))

    # Ragged check: numel % 128 != 0 falls back to the fused jnp.minimum path.
    r1 = jax.random.normal(k5, (3, 5, 7), dtype=jnp.float32)
    r2 = jax.random.normal(k6, (3, 5, 7), dtype=jnp.float32)
    out4 = jax.block_until_ready(and_module_forward(r1, r2))
    assert bool(jnp.all(out4 == jnp.minimum(r1, r2)))

    print("KERNEL_OK")
</pallas_src>

<mosaic_0001>
module attributes {stable_mosaic.version = 11 : i64} {
  func.func @_min_kernel(%arg0: i32, %arg1: memref<16x128xf32, #tpu.memory_space<vmem>>, %arg2: memref<16x128xf32, #tpu.memory_space<vmem>>, %arg3: memref<16x128xf32, #tpu.memory_space<vmem>>) attributes {dimension_semantics = [#tpu.dimension_semantics<parallel>], iteration_bounds = array<i64: 1>, scalar_prefetch = 0 : i64, scratch_operands = 0 : i64, tpu.core_type = #tpu.core_type<tc>, window_params = [{transform_indices = @transform_0, window_bounds = array<i64: 16, 128>}, {transform_indices = @transform_1, window_bounds = array<i64: 16, 128>}, {transform_indices = @transform_2, window_bounds = array<i64: 16, 128>}]} {
    %c0 = arith.constant 0 : index
    %c0_0 = arith.constant 0 : index
    %0 = vector.load %arg1[%c0, %c0_0] : memref<16x128xf32, #tpu.memory_space<vmem>>, vector<16x128xf32>
    %c0_1 = arith.constant 0 : index
    %c0_2 = arith.constant 0 : index
    %1 = vector.load %arg2[%c0_1, %c0_2] : memref<16x128xf32, #tpu.memory_space<vmem>>, vector<16x128xf32>
    %2 = arith.minimumf %0, %1 : vector<16x128xf32>
    %c0_3 = arith.constant 0 : index
    %c0_4 = arith.constant 0 : index
    %3 = vector.load %arg3[%c0_3, %c0_4] : memref<16x128xf32, #tpu.memory_space<vmem>>, vector<16x128xf32>
    tpu.vector_store %arg3[%c0_3, %c0_4], %2 {strides = array<i32>} : memref<16x128xf32, #tpu.memory_space<vmem>>, vector<16x128xf32>,
    return
  }
  func.func @transform_0(%arg0: i32) -> (i32, i32) {
    %c0_i32 = arith.constant 0 : i32
    %c0_i32_0 = arith.constant 0 : i32
    return %arg0, %c0_i32 : i32, i32
  }
  func.func @transform_1(%arg0: i32) -> (i32, i32) {
    %c0_i32 = arith.constant 0 : i32
    %c0_i32_0 = arith.constant 0 : i32
    return %arg0, %c0_i32 : i32, i32
  }
  func.func @transform_2(%arg0: i32) -> (i32, i32) {
    %c0_i32 = arith.constant 0 : i32
    %c0_i32_0 = arith.constant 0 : i32
    return %arg0, %c0_i32 : i32, i32
  }
}

</mosaic_0001>

<bundles_post_ra>
// kernel: tpu_custom_call.1
= control target key start
LH: loop header
LB: loop body
LE: loop exit
PB: predicated region body
PF: predicated region fallthrough
CT: control target
= control target key end

     0   :  { %7 = vsyncpa [#allocation3], 0  ;;  %s208_s0 = inlined_call_operand.hbm [shape: f32[16,128], index: 0, kind: input, shape index: {}]   ;;  %s209_s1 = inlined_call_operand.hbm [shape: f32[16,128], index: 1, kind: input, shape index: {}]   ;;  %s210_s2 = inlined_call_operand.hbm [shape: f32[16,128], index: 2, kind: output, shape index: {}]  }
   0x1   :  { %8 = vsyncpa [#allocation6], 0 }
   0x2   :  { %9 = vsyncpa [#allocation4], 0  ;;  %s143_s9 = smov [#allocation2]   ;;  %s71_s13 = scalar_lea.hbm %s208_s0, 256 }
   0x3   :  { %s15_s10 = sshll.u32 %s143_s9, 4  ;;  %p72_p0 = scmp.ne.s32.totalorder %s208_s0, %s71_s13  ;;  %s16_s10 = int_to_ptr.vmem [resolvable:$true] %s15_s10 }
   0x4   :  { %p75_p1 = scmp.lt.u32.totalorder %s71_s13, %s208_s0 }
   0x6   :  { %p77_p2 = pnand %p75_p1, %p72_p0 }
   0x8   :  { %80 = shalt.err (!%p77_p2)
}
   0x9   :  { %s81_s18 = scalar_lea.vmem %s16_s10, 256  ;;  %p86_p4 = scmp.lt.s32.totalorder %s16_s10, %s16_s10 }
   0xa   :  { %p82_p3 = scmp.ne.s32.totalorder %s16_s10, %s81_s18  ;;  %p87_p5 = scmp.lt.s32.totalorder %s81_s18, %s81_s18 }
   0xc   :  { %p88_p6 = por %p87_p5, %p86_p4 }
   0xe   :  { %p89_p7 = pnand %p88_p6, %p82_p3 }
  0x10   :  { %92 = shalt.err (!%p89_p7)
}
  0x11   :  { %s144_s19 = smov 128   ;;  %s145_s20 = smov 8  }
  0x12   :  { %21 = dma.hbm_to_vmem [thread:$0]  %s208_s0, 256, %s16_s10, [#allocation3], %s144_s19, %s144_s19, %s145_s20  }
  0x13   :  { %s146_s23 = smov [#allocation5]   ;;  %s93_s27 = scalar_lea.hbm %s209_s1, 256 }
  0x14   :  { %s27_s24 = sshll.u32 %s146_s23, 4  ;;  %p94_p8 = scmp.ne.s32.totalorder %s209_s1, %s93_s27  ;;  %s28_s24 = int_to_ptr.vmem [resolvable:$true] %s27_s24 }
  0x15   :  { %p97_p9 = scmp.lt.u32.totalorder %s93_s27, %s209_s1 }
  0x17   :  { %p99_p10 = pnand %p97_p9, %p94_p8 }
  0x19   :  { %102 = shalt.err (!%p99_p10)
}
  0x1a   :  { %s103_s4 = scalar_lea.vmem %s28_s24, 256  ;;  %p108_p12 = scmp.lt.s32.totalorder %s28_s24, %s28_s24 }
  0x1b   :  { %p104_p11 = scmp.ne.s32.totalorder %s28_s24, %s103_s4  ;;  %p109_p13 = scmp.lt.s32.totalorder %s103_s4, %s103_s4 }
  0x1d   :  { %p110_p0 = por %p109_p13, %p108_p12 }
  0x1f   :  { %p111_p1 = pnand %p110_p0, %p104_p11 }
  0x21   :  { %114 = shalt.err (!%p111_p1)
}
  0x22   :  { %33 = dma.hbm_to_vmem [thread:$0]  %s209_s1, 256, %s28_s24, [#allocation6], %s144_s19, %s144_s19, %s145_s20  }
  0x23   :  { %137 = dma.done.wait [#allocation3], 256  }
  0x24   :  { %138 = vsyncadd [#allocation3], 4294967040 }
  0x25   :  { %139 = dma.done.wait [#allocation6], 256  }
  0x26   :  { %140 = vsyncadd [#allocation6], 4294967040  ;;  %s147_s6 = smov [#allocation7]   ;;  %v40_v0 = vld [vmem:[#allocation2] sm:$0xff]  ;;  %v42_v1 = vld [vmem:[#allocation5] sm:$0xff] }
  0x27   :  { %s53_s7 = sshll.u32 %s147_s6, 4  ;;  %v41_v2 = vld [vmem:[#allocation2 + $0x8] sm:$0xff]  ;;  %v44_v3 = vmin.f32 %v40_v0, %v42_v1  ;;  %v43_v4 = vld [vmem:[#allocation5 + $0x8] sm:$0xff]  ;;  %s54_s7 = int_to_ptr.vmem [resolvable:$true] %s53_s7 }
  0x28   :  { %v45_v5 = vmin.f32 %v41_v2, %v43_v4  ;;  %s115_s8 = scalar_lea.vmem %s54_s7, 256  ;;  %p120_p3 = scmp.lt.s32.totalorder %s54_s7, %s54_s7 }
  0x29   :  { %46 = vst [vmem:[#allocation7] sm:$0xff] %v44_v3  ;;  %p116_p2 = scmp.ne.s32.totalorder %s54_s7, %s115_s8  ;;  %p121_p4 = scmp.lt.s32.totalorder %s115_s8, %s115_s8 }
  0x2a   :  { %47 = vst [vmem:[#allocation7 + $0x8] sm:$0xff] %v45_v5 }
  0x2b   :  { %p122_p5 = por %p121_p4, %p120_p3 }
  0x2d   :  { %p123_p6 = pnand %p122_p5, %p116_p2 }
  0x2f   :  { %126 = shalt.err (!%p123_p6)
}
  0x30   :  { %s127_s10 = scalar_lea.hbm %s210_s2, 256 }
  0x31   :  { %p128_p7 = scmp.ne.s32.totalorder %s210_s2, %s127_s10  ;;  %p131_p8 = scmp.lt.u32.totalorder %s127_s10, %s210_s2 }
  0x33   :  { %p133_p9 = pnand %p131_p8, %p128_p7 }
  0x35   :  { %136 = shalt.err (!%p133_p9)
}
  0x36   :  { %59 = dma.vmem_to_hbm [thread:$0]  %s54_s7, 256, %s210_s2, [#allocation4], %s144_s19, %s144_s19, %s145_s20  }
  0x37   :  { %141 = dma.done.wait [#allocation4], 256  }
  0x38   :  { %142 = vsyncadd [#allocation4], 4294967040 }
  0x39   :  { %63 = vsyncpa [#allocation3], 1 }
  0x3a   :  { %64 = vsyncpa [#allocation6], 1 }
  0x3b   :  { %65 = vsyncpa [#allocation4], 1 }

</bundles_post_ra>
